<compile_context>
chip_gen: v7x
topology: tpu7x:2x2x1
jax: 0.10.0
libtpu: 0.0.40
codegen_flags: <defaults>
</compile_context>

<pallas_src>
import math
import functools

import jax
import jax.numpy as jnp
from jax.experimental import pallas as pl
from jax.experimental.pallas import tpu as pltpu

_LANE = 128


# ---------------------------------------------------------------------------
# Kernels
# ---------------------------------------------------------------------------

def _noisy_linear_train_kernel(x_ref, wmu_ref, wsig_ref, eps_in_ref,
                               eps_out_ref, bias_ref, o_ref, acc_ref,
                               *, use_bf16):
    k = pl.program_id(2)

    @pl.when(k == 0)
    def _():
        acc_ref[...] = jnp.zeros_like(acc_ref)

    # Rebuild the factorised noise tile (tk,1)*(1,tn) and fuse into W on the
    # VPU in f32 (v5e has no bf16 VALU); cast only the MXU operands.
    w = wmu_ref[...] + wsig_ref[...] * (eps_in_ref[...] * eps_out_ref[...])
    x = x_ref[...]
    if use_bf16:
        x = x.astype(jnp.bfloat16)
        w = w.astype(jnp.bfloat16)
    acc_ref[...] += jnp.dot(x, w, preferred_element_type=jnp.float32)

    @pl.when(k == pl.num_programs(2) - 1)
    def _():
        o_ref[...] = (acc_ref[...] + bias_ref[...]).astype(o_ref.dtype)


def _linear_eval_kernel(x_ref, wmu_ref, bias_ref, o_ref, acc_ref, *, use_bf16):
    k = pl.program_id(2)

    @pl.when(k == 0)
    def _():
        acc_ref[...] = jnp.zeros_like(acc_ref)

    x = x_ref[...]
    w = wmu_ref[...]
    if use_bf16:
        x = x.astype(jnp.bfloat16)
        w = w.astype(jnp.bfloat16)
    acc_ref[...] += jnp.dot(x, w, preferred_element_type=jnp.float32)

    @pl.when(k == pl.num_programs(2) - 1)
    def _():
        o_ref[...] = (acc_ref[...] + bias_ref[...]).astype(o_ref.dtype)


# ---------------------------------------------------------------------------
# Wrapper
# ---------------------------------------------------------------------------

def _round_up(a, b):
    return (a + b - 1) // b * b


def _pick_tile(padded_dim, cap=512):
    for t in (512, 256, 128):
        if t <= cap and padded_dim % t == 0:
            return t
    return padded_dim  # padded_dim is always a multiple of 128


@functools.partial(jax.jit,
                   static_argnames=("out_features", "training", "use_bf16"))
def noisy_linear_forward(x, params, *, out_features, training=True,
                         use_bf16=True):
    """x: (batch, in_features) f32. params: dict from init_noisy_linear."""
    M, K = x.shape
    N = out_features
    Kp, Np = params["weight_mu"].shape            # padded at init (K-major)

    tk = _pick_tile(Kp)
    tn = _pick_tile(Np)
    tm = min(512, _round_up(M, 8))
    Mp = _round_up(M, tm)
    # v7x has 2 TensorCores sharded over the parallel axes: prefer >=2 output
    # tiles when the shapes allow it.
    if (Mp // tm) * (Np // tn) < 2 and tn > 128:
        tn //= 2
    grid = (Mp // tm, Np // tn, Kp // tk)

    # Weights are pre-padded at init; only x may need (cheap) padding here.
    xp = x if (M == Mp and K == Kp) else jnp.pad(x, ((0, Mp - M), (0, Kp - K)))

    x_spec = pl.BlockSpec((tm, tk), lambda i, j, k: (i, k))
    w_spec = pl.BlockSpec((tk, tn), lambda i, j, k: (k, j))
    col_spec = pl.BlockSpec((tk, 1), lambda i, j, k: (k, 0))
    row_spec = pl.BlockSpec((1, tn), lambda i, j, k: (0, j))
    out_spec = pl.BlockSpec((tm, tn), lambda i, j, k: (i, j))

    compiler_params = pltpu.CompilerParams(
        dimension_semantics=("parallel", "parallel", "arbitrary"),
        vmem_limit_bytes=32 * 1024 * 1024)

    if training:
        # Fused bias computed once per call (O(N) vector op), one input stream.
        bias = params["bias_mu"] + params["bias_sigma"] * params["bias_epsilon"]
        cost = pl.CostEstimate(
            flops=2 * Mp * Np * Kp,
            transcendentals=0,
            bytes_accessed=4 * (Mp * Kp + 2 * Kp * Np + Kp + 2 * Np + Mp * Np))

        out = pl.pallas_call(
            functools.partial(_noisy_linear_train_kernel, use_bf16=use_bf16),
            out_shape=jax.ShapeDtypeStruct((Mp, Np), x.dtype),
            grid_spec=pltpu.PrefetchScalarGridSpec(
                num_scalar_prefetch=0,
                grid=grid,
                in_specs=[x_spec, w_spec, w_spec, col_spec, row_spec, row_spec],
                out_specs=out_spec,
                scratch_shapes=[pltpu.VMEM((tm, tn), jnp.float32)]),
            compiler_params=compiler_params,
            cost_estimate=cost,
        )(xp, params["weight_mu"], params["weight_sigma"],
          params["eps_in"], params["eps_out"], bias)
    else:
        cost = pl.CostEstimate(
            flops=2 * Mp * Np * Kp,
            transcendentals=0,
            bytes_accessed=4 * (Mp * Kp + Kp * Np + Np + Mp * Np))

        out = pl.pallas_call(
            functools.partial(_linear_eval_kernel, use_bf16=use_bf16),
            out_shape=jax.ShapeDtypeStruct((Mp, Np), x.dtype),
            grid_spec=pltpu.PrefetchScalarGridSpec(
                num_scalar_prefetch=0,
                grid=grid,
                in_specs=[x_spec, w_spec, row_spec],
                out_specs=out_spec,
                scratch_shapes=[pltpu.VMEM((tm, tn), jnp.float32)]),
            compiler_params=compiler_params,
            cost_estimate=cost,
        )(xp, params["weight_mu"], params["bias_mu"])

    if M == Mp and N == Np:
        return out
    return out[:M, :N]


# ---------------------------------------------------------------------------
# Init (mirrors reset_parameters() + reset_noise()).
# Weights are stored K-major, i.e. (in_features, out_features), and padded
# once here to lane-aligned (Kp, Np) so the forward pass never pads them.
# weight_epsilon is kept factorised as eps_in / eps_out (never materialised).
# ---------------------------------------------------------------------------

def _scale_noise(key, size):
    # x = sign(n) * sqrt(|n|),  n ~ N(0, 1)   (matches NoisyLinear._scale_noise)
    n = jax.random.normal(key, (size,), dtype=jnp.float32)
    return jnp.sign(n) * jnp.sqrt(jnp.abs(n))


def init_noisy_linear(key, in_features, out_features, std_init=0.4):
    k_wmu, k_bmu, k_ein, k_eout, k_beps = jax.random.split(key, 5)
    mu_range = 1.0 / math.sqrt(in_features)

    Kp = _round_up(in_features, _LANE)
    Np = _round_up(out_features, _LANE)
    pk, pn = Kp - in_features, Np - out_features

    weight_mu = jax.random.uniform(
        k_wmu, (in_features, out_features), jnp.float32, -mu_range, mu_range)
    weight_sigma = jnp.full((in_features, out_features),
                            std_init / math.sqrt(in_features), jnp.float32)
    bias_mu = jax.random.uniform(
        k_bmu, (out_features,), jnp.float32, -mu_range, mu_range)
    bias_sigma = jnp.full((out_features,),
                          std_init / math.sqrt(out_features), jnp.float32)

    eps_in = _scale_noise(k_ein, in_features)       # (in,)
    eps_out = _scale_noise(k_eout, out_features)    # (out,)
    bias_epsilon = _scale_noise(k_beps, out_features)

    # Pad once; padded rows/cols are zero so they contribute nothing.
    return dict(
        weight_mu=jnp.pad(weight_mu, ((0, pk), (0, pn))),          # (Kp, Np)
        weight_sigma=jnp.pad(weight_sigma, ((0, pk), (0, pn))),    # (Kp, Np)
        eps_in=jnp.pad(eps_in, (0, pk)).reshape(Kp, 1),            # (Kp, 1)
        eps_out=jnp.pad(eps_out, (0, pn)).reshape(1, Np),          # (1, Np)
        bias_mu=jnp.pad(bias_mu, (0, pn)).reshape(1, Np),          # (1, Np)
        bias_sigma=jnp.pad(bias_sigma, (0, pn)).reshape(1, Np),    # (1, Np)
        bias_epsilon=jnp.pad(bias_epsilon, (0, pn)).reshape(1, Np),
    )


if __name__ == "__main__":
    key = jax.random.PRNGKey(0)
    k_params, k_x = jax.random.split(key)

    batch, in_features, out_features = 8, 32, 64
    params = init_noisy_linear(k_params, in_features, out_features,
                               std_init=0.4)
    x = jax.random.normal(k_x, (batch, in_features), dtype=jnp.float32)

    # Kernel forwards: bf16-MXU training (default), exact-f32 training, eval.
    y_train = jax.block_until_ready(
        noisy_linear_forward(x, params, out_features=out_features,
                             training=True))
    y_train_f32 = jax.block_until_ready(
        noisy_linear_forward(x, params, out_features=out_features,
                             training=True, use_bf16=False))
    y_eval = jax.block_until_ready(
        noisy_linear_forward(x, params, out_features=out_features,
                             training=False))

    # Pure-JAX references built from the padded params (padded cols are zero).
    Kp, Np = params["weight_mu"].shape
    xp = jnp.pad(x, ((0, 0), (0, Kp - in_features)))
    w_noisy = params["weight_mu"] + params["weight_sigma"] * (
        params["eps_in"] * params["eps_out"])
    b_noisy = params["bias_mu"] + params["bias_sigma"] * params["bias_epsilon"]

    ref_train_f32 = (xp @ w_noisy + b_noisy)[:, :out_features]
    ref_train_bf16 = (jnp.dot(xp.astype(jnp.bfloat16),
                              w_noisy.astype(jnp.bfloat16),
                              preferred_element_type=jnp.float32)
                      + b_noisy)[:, :out_features]
    ref_eval_f32 = (xp @ params["weight_mu"]
                    + params["bias_mu"])[:, :out_features]
    ref_eval_bf16 = (jnp.dot(xp.astype(jnp.bfloat16),
                             params["weight_mu"].astype(jnp.bfloat16),
                             preferred_element_type=jnp.float32)
                     + params["bias_mu"])[:, :out_features]

    assert y_train.shape == (batch, out_features)
    assert y_eval.shape == (batch, out_features)
    # Exact-parity f32 path.
    assert jnp.allclose(y_train_f32, ref_train_f32, atol=1e-5, rtol=1e-5)
    # bf16-MXU path: tight vs bf16-operand reference, loose vs pure-f32 math.
    assert jnp.allclose(y_train, ref_train_bf16, atol=1e-4, rtol=1e-4)
    assert jnp.allclose(y_train, ref_train_f32, atol=5e-2, rtol=5e-2)
    assert jnp.allclose(y_eval, ref_eval_bf16, atol=1e-4, rtol=1e-4)
    assert jnp.allclose(y_eval, ref_eval_f32, atol=5e-2, rtol=5e-2)

    print("KERNEL_OK")
</pallas_src>

<mosaic_0001>
module attributes {stable_mosaic.version = 11 : i64} {
  func.func @_noisy_linear_train_kernel(%arg0: i32, %arg1: i32, %arg2: i32, %arg3: memref<8x128xf32, #tpu.memory_space<vmem>>, %arg4: memref<128x128xf32, #tpu.memory_space<vmem>>, %arg5: memref<128x128xf32, #tpu.memory_space<vmem>>, %arg6: memref<128x1xf32, #tpu.memory_space<vmem>>, %arg7: memref<1x128xf32, #tpu.memory_space<vmem>>, %arg8: memref<1x128xf32, #tpu.memory_space<vmem>>, %arg9: memref<8x128xf32, #tpu.memory_space<vmem>>, %arg10: memref<8x128xf32, #tpu.memory_space<vmem>>) attributes {dimension_semantics = [#tpu.dimension_semantics<parallel>, #tpu.dimension_semantics<parallel>, #tpu.dimension_semantics<arbitrary>], iteration_bounds = array<i64: 1, 1, 1>, scalar_prefetch = 0 : i64, scratch_operands = 1 : i64, tpu.core_type = #tpu.core_type<tc>, window_params = [{transform_indices = @transform_0, window_bounds = array<i64: 8, 128>}, {transform_indices = @transform_1, window_bounds = array<i64: 128, 128>}, {transform_indices = @transform_2, window_bounds = array<i64: 128, 128>}, {transform_indices = @transform_3, window_bounds = array<i64: 128, 1>}, {transform_indices = @transform_4, window_bounds = array<i64: 1, 128>}, {transform_indices = @transform_5, window_bounds = array<i64: 1, 128>}, {transform_indices = @transform_6, window_bounds = array<i64: 8, 128>}]} {
    %c0_i32 = arith.constant 0 : i32
    %0 = arith.cmpi eq, %arg2, %c0_i32 : i32
    %1 = arith.extui %0 : i1 to i32
    %c0_i32_0 = arith.constant 0 : i32
    %2 = arith.cmpi ne, %1, %c0_i32_0 : i32
    scf.if %2 {
      %cst_16 = arith.constant 0.000000e+00 : f32
      %22 = vector.broadcast %cst_16 : f32 to vector<8x128xf32>
      %c0_17 = arith.constant 0 : index
      %c0_18 = arith.constant 0 : index
      %23 = vector.load %arg10[%c0_17, %c0_18] : memref<8x128xf32, #tpu.memory_space<vmem>>, vector<8x128xf32>
      tpu.vector_store %arg10[%c0_17, %c0_18], %22 {strides = array<i32>} : memref<8x128xf32, #tpu.memory_space<vmem>>, vector<8x128xf32>,
    } else {
    }
    %c0 = arith.constant 0 : index
    %c0_1 = arith.constant 0 : index
    %3 = vector.load %arg4[%c0, %c0_1] : memref<128x128xf32, #tpu.memory_space<vmem>>, vector<128x128xf32>
    %c0_2 = arith.constant 0 : index
    %c0_3 = arith.constant 0 : index
    %4 = vector.load %arg5[%c0_2, %c0_3] : memref<128x128xf32, #tpu.memory_space<vmem>>, vector<128x128xf32>
    %c0_4 = arith.constant 0 : index
    %c0_5 = arith.constant 0 : index
    %5 = vector.load %arg6[%c0_4, %c0_5] : memref<128x1xf32, #tpu.memory_space<vmem>>, vector<128x1xf32>
    %c0_6 = arith.constant 0 : index
    %c0_7 = arith.constant 0 : index
    %6 = vector.load %arg7[%c0_6, %c0_7] : memref<1x128xf32, #tpu.memory_space<vmem>>, vector<1x128xf32>
    %7 = vector.broadcast %5 : vector<128x1xf32> to vector<128x128xf32>
    %8 = vector.broadcast %6 : vector<1x128xf32> to vector<128x128xf32>
    %9 = arith.mulf %7, %8 : vector<128x128xf32>
    %10 = arith.mulf %4, %9 : vector<128x128xf32>
    %11 = arith.addf %3, %10 : vector<128x128xf32>
    %c0_8 = arith.constant 0 : index
    %c0_9 = arith.constant 0 : index
    %12 = vector.load %arg3[%c0_8, %c0_9] : memref<8x128xf32, #tpu.memory_space<vmem>>, vector<8x128xf32>
    %13 = arith.truncf %12 : vector<8x128xf32> to vector<8x128xbf16>
    %14 = arith.truncf %11 : vector<128x128xf32> to vector<128x128xbf16>
    %c0_10 = arith.constant 0 : index
    %c0_11 = arith.constant 0 : index
    %15 = vector.load %arg10[%c0_10, %c0_11] : memref<8x128xf32, #tpu.memory_space<vmem>>, vector<8x128xf32>
    %cst = arith.constant dense<0.000000e+00> : vector<8x128xf32>
    %16 = tpu.matmul %13, %14, %cst {dimension_numbers = #tpu.dot_dimension_numbers<[1], [0], [0], [1], [0, 0, 1, 1], [], []>} : vector<8x128xbf16>, vector<128x128xbf16>, vector<8x128xf32> -> vector<8x128xf32>
    %17 = arith.addf %15, %16 : vector<8x128xf32>
    %c0_12 = arith.constant 0 : index
    %c0_13 = arith.constant 0 : index
    %18 = vector.load %arg10[%c0_12, %c0_13] : memref<8x128xf32, #tpu.memory_space<vmem>>, vector<8x128xf32>
    tpu.vector_store %arg10[%c0_12, %c0_13], %17 {strides = array<i32>} : memref<8x128xf32, #tpu.memory_space<vmem>>, vector<8x128xf32>,
    %c0_i32_14 = arith.constant 0 : i32
    %19 = arith.cmpi eq, %arg2, %c0_i32_14 : i32
    %20 = arith.extui %19 : i1 to i32
    %c0_i32_15 = arith.constant 0 : i32
    %21 = arith.cmpi ne, %20, %c0_i32_15 : i32
    scf.if %21 {
      %c0_16 = arith.constant 0 : index
      %c0_17 = arith.constant 0 : index
      %22 = vector.load %arg10[%c0_16, %c0_17] : memref<8x128xf32, #tpu.memory_space<vmem>>, vector<8x128xf32>
      %c0_18 = arith.constant 0 : index
      %c0_19 = arith.constant 0 : index
      %23 = vector.load %arg8[%c0_18, %c0_19] : memref<1x128xf32, #tpu.memory_space<vmem>>, vector<1x128xf32>
      %24 = vector.broadcast %23 : vector<1x128xf32> to vector<8x128xf32>
      %25 = arith.addf %22, %24 : vector<8x128xf32>
      %c0_20 = arith.constant 0 : index
      %c0_21 = arith.constant 0 : index
      %26 = vector.load %arg9[%c0_20, %c0_21] : memref<8x128xf32, #tpu.memory_space<vmem>>, vector<8x128xf32>
      tpu.vector_store %arg9[%c0_20, %c0_21], %25 {strides = array<i32>} : memref<8x128xf32, #tpu.memory_space<vmem>>, vector<8x128xf32>,
    } else {
    }
    return
  }
  func.func @transform_0(%arg0: i32, %arg1: i32, %arg2: i32) -> (i32, i32) {
    %c0_i32 = arith.constant 0 : i32
    return %arg0, %arg2 : i32, i32
  }
  func.func @transform_1(%arg0: i32, %arg1: i32, %arg2: i32) -> (i32, i32) {
    %c0_i32 = arith.constant 0 : i32
    return %arg2, %arg1 : i32, i32
  }
  func.func @transform_2(%arg0: i32, %arg1: i32, %arg2: i32) -> (i32, i32) {
    %c0_i32 = arith.constant 0 : i32
    return %arg2, %arg1 : i32, i32
  }
  func.func @transform_3(%arg0: i32, %arg1: i32, %arg2: i32) -> (i32, i32) {
    %c0_i32 = arith.constant 0 : i32
    %c0_i32_0 = arith.constant 0 : i32
    return %arg2, %c0_i32 : i32, i32
  }
  func.func @transform_4(%arg0: i32, %arg1: i32, %arg2: i32) -> (i32, i32) {
    %c0_i32 = arith.constant 0 : i32
    %c0_i32_0 = arith.constant 0 : i32
    return %c0_i32, %arg1 : i32, i32
  }
  func.func @transform_5(%arg0: i32, %arg1: i32, %arg2: i32) -> (i32, i32) {
    %c0_i32 = arith.constant 0 : i32
    %c0_i32_0 = arith.constant 0 : i32
    return %c0_i32, %arg1 : i32, i32
  }
  func.func @transform_6(%arg0: i32, %arg1: i32, %arg2: i32) -> (i32, i32) {
    %c0_i32 = arith.constant 0 : i32
    return %arg0, %arg1 : i32, i32
  }
}

</mosaic_0001>

<bundles_post_ra>
// kernel: noisy_linear_forward.1
= control target key start
LH: loop header
LB: loop body
LE: loop exit
PB: predicated region body
PF: predicated region fallthrough
CT: control target
= control target key end

     0   :  { %11 = vsyncpa [#allocation4], 0  ;;  %s594_s0 = inlined_call_operand.vmem [shape: f32[8,128], index: 0, kind: input, shape index: {}]   ;;  %s595_s1 = inlined_call_operand.vmem [shape: f32[128,128], index: 1, kind: input, shape index: {}]   ;;  %s596_s2 = inlined_call_operand.hbm [shape: f32[128,128], index: 2, kind: input, shape index: {}]   ;;  %s597_s3 = inlined_call_operand.vmem [shape: f32[128,1], index: 3, kind: input, shape index: {}]   ;;  %s598_s4 = inlined_call_operand.vmem [shape: f32[1,128], index: 4, kind: input, shape index: {}]   ;;  %s599_s5 = inlined_call_operand.vmem [shape: f32[1,128], index: 5, kind: input, shape index: {}]   ;;  %s600_s6 = inlined_call_operand.hbm [shape: f32[8,128], index: 6, kind: output, shape index: {}]  }
   0x1   :  { %12 = vsyncpa [#allocation5], 0  ;;  %s396_s21 = smov [#allocation3]   ;;  %s348_s25 = scalar_lea.hbm %s596_s2, 2048 }
   0x2   :  { %s22_s22 = sshll.u32 %s396_s21, 4  ;;  %p349_p0 = scmp.ne.s32.totalorder %s596_s2, %s348_s25  ;;  %s23_s22 = int_to_ptr.vmem [resolvable:$true] %s22_s22 }
   0x3   :  { %p352_p1 = scmp.lt.u32.totalorder %s348_s25, %s596_s2 }
   0x5   :  { %p354_p2 = pnand %p352_p1, %p349_p0 }
   0x7   :  { %357 = shalt.err (!%p354_p2)
}
   0x8   :  { %s358_s30 = scalar_lea.vmem %s23_s22, 2048  ;;  %p363_p4 = scmp.lt.s32.totalorder %s23_s22, %s23_s22 }
   0x9   :  { %p359_p3 = scmp.ne.s32.totalorder %s23_s22, %s358_s30  ;;  %p364_p5 = scmp.lt.s32.totalorder %s358_s30, %s358_s30 }
   0xb   :  { %p365_p6 = por %p364_p5, %p363_p4 }
   0xd   :  { %p366_p7 = pnand %p365_p6, %p359_p3 }
   0xf   :  { %369 = shalt.err (!%p366_p7)
}
  0x10   :  { %s397_s7 = smov 128   ;;  %s398_s8 = smov 8  }
  0x11   :  { %28 = dma.hbm_to_vmem [thread:$0]  %s596_s2, 2048, %s23_s22, [#allocation4], %s397_s7, %s397_s7, %s398_s8  }
  0x12   :  { %392 = dma.done.wait [#allocation4], 2048  }
  0x13   :  { %393 = vsyncadd [#allocation4], 4294965248  ;;  %v399_v0 = vmov 0   ;;  %v78_v1 = vld [vmem:[%s597_s3 + $0x10] sm:$0xff]  ;;  %v76_v2 = vld [vmem:[%s597_s3] sm:$0xff]  ;;  %v400_v9 = vmov 0.0  }
  0x14   :  { %347 = vset.pattern.permute.xlu1 %v399_v0  ;;  %346 = vset.pattern.permute.xlu0 %v399_v0  ;;  %v79_v3 = vld [vmem:[%s597_s3 + $0x18] sm:$0xff]  ;;  %v77_v4 = vld [vmem:[%s597_s3 + $0x8] sm:$0xff]  ;;  %v80_v6 = vld [vmem:[%s597_s3 + $0x20] sm:$0xff]  ;;  %vm401_vm0 = vmmov 0  }
  0x15   :  { %105 = vperm.xlu1 %347, %v78_v1   ;;  %95 = vperm.xlu0 %346, %v76_v2   ;;  %v81_v5 = vld [vmem:[%s597_s3 + $0x28] sm:$0xff]  ;;  %v83_v7 = vld [vmem:[%s597_s3 + $0x38] sm:$0xff]  ;;  %v82_v8 = vld [vmem:[%s597_s3 + $0x30] sm:$0xff] }
  0x16   :  { %319 = vmatprep.subr.bf16.mxu0 %v400_v9  ;;  %v85_v10 = vld [vmem:[%s597_s3 + $0x48] sm:$0xff]  ;;  %v84_v11 = vld [vmem:[%s597_s3 + $0x40] sm:$0xff]  ;;  %v87_v12 = vld [vmem:[%s597_s3 + $0x58] sm:$0xff]  ;;  %335 = vmatprep.mubr.msk.bf16.mxu0 %vm401_vm0, %v400_v9 }
  0x17   :  { %v86_v13 = vld [vmem:[%s597_s3 + $0x50] sm:$0xff]  ;;  %v89_v14 = vld [vmem:[%s597_s3 + $0x68] sm:$0xff]  ;;  %v88_v15 = vld [vmem:[%s597_s3 + $0x60] sm:$0xff] }
  0x18   :  { %v91_v16 = vld [vmem:[%s597_s3 + $0x78] sm:$0xff]  ;;  %v90_v17 = vld [vmem:[%s597_s3 + $0x70] sm:$0xff]  ;;  %v503_v18 = vld [vmem:[%s598_s4] ss:$0 sm:$0xff] }
  0x19   :  { %110 = vperm.xlu1 %347, %v79_v3   ;;  %100 = vperm.xlu0 %346, %v77_v4   ;;  %v60_v23 = vld [vmem:[#allocation3] sm:$0xff]  ;;  %v62_v24 = vld [vmem:[#allocation3 + $0x10] sm:$0xff]  ;;  %v63_v26 = vld [vmem:[#allocation3 + $0x18] sm:$0xff] }
  0x1a   :  { %v61_v28 = vld [vmem:[#allocation3 + $0x8] sm:$0xff]  ;;  %v44_v33 = vld [vmem:[%s595_s1] sm:$0xff]  ;;  %v46_v35 = vld [vmem:[%s595_s1 + $0x10] sm:$0xff] }
  0x1b   :  { %v45_v34 = vld [vmem:[%s595_s1 + $0x8] sm:$0xff]  ;;  %v47_v36 = vld [vmem:[%s595_s1 + $0x18] sm:$0xff]  ;;  %v64_v42 = vld [vmem:[#allocation3 + $0x20] sm:$0xff] }
  0x1c   :  { %v65_v40 = vld [vmem:[#allocation3 + $0x28] sm:$0xff]  ;;  %v48_v53 = vld [vmem:[%s595_s1 + $0x20] sm:$0xff]  ;;  %v67_v55 = vld [vmem:[#allocation3 + $0x38] sm:$0xff] }
  0x1d   :  { %120 = vperm.xlu1 %347, %v81_v5   ;;  %115 = vperm.xlu0 %346, %v80_v6   ;;  %v49_v49 = vld [vmem:[%s595_s1 + $0x28] sm:$0xff]  ;;  %v66_v57 = vld [vmem:[#allocation3 + $0x30] sm:$0xff]  ;;  %v51_v63 = vld [vmem:[%s595_s1 + $0x38] sm:$0xff] }
  0x1e   :  { %v50_v1 = vld [vmem:[%s595_s1 + $0x30] sm:$0xff]  ;;  %v69_v4 = vld [vmem:[#allocation3 + $0x48] sm:$0xff]  ;;  %v68_v6 = vld [vmem:[#allocation3 + $0x40] sm:$0xff] }
  0x21   :  { %130 = vperm.xlu1 %347, %v83_v7   ;;  %125 = vperm.xlu0 %346, %v82_v8  }
  0x25   :  { %140 = vperm.xlu1 %347, %v85_v10   ;;  %135 = vperm.xlu0 %346, %v84_v11  }
  0x29   :  { %150 = vperm.xlu1 %347, %v87_v12   ;;  %145 = vperm.xlu0 %346, %v86_v13   ;;  %v53_v12 = vld [vmem:[%s595_s1 + $0x48] sm:$0xff] }
  0x2d   :  { %160 = vperm.xlu1 %347, %v89_v14   ;;  %155 = vperm.xlu0 %346, %v88_v15  }
  0x31   :  { %170 = vperm.xlu1 %347, %v91_v16   ;;  %165 = vperm.xlu0 %346, %v90_v17   ;;  %v52_v16 = vld [vmem:[%s595_s1 + $0x40] sm:$0xff] }
  0x94   :  { %v106_v19 = vpop.permute.xlu1 %105  ;;  %v96_v20 = vpop.permute.xlu0 %95 }
  0x95   :  { %v179_v21 = vmul.f32 %v503_v18, %v96_v20  ;;  %v181_v22 = vmul.f32 %v503_v18, %v106_v19  ;;  %v71_v19 = vld [vmem:[#allocation3 + $0x58] sm:$0xff] }
  0x97   :  { %v195_v29 = vmul.f32 %v179_v21, %v60_v23  ;;  %v197_v32 = vmul.f32 %v181_v22, %v62_v24  ;;  %v70_v21 = vld [vmem:[#allocation3 + $0x50] sm:$0xff] }
  0x98   :  { %v111_v25 = vpop.permute.xlu1 %110  ;;  %v101_v27 = vpop.permute.xlu0 %100 }
  0x99   :  { %v182_v30 = vmul.f32 %v503_v18, %v111_v25  ;;  %v180_v31 = vmul.f32 %v503_v18, %v101_v27  ;;  %v211_v45 = vadd.f32 %v195_v29, %v44_v33  ;;  %v213_v47 = vadd.f32 %v197_v32, %v46_v35  ;;  %v55_v27 = vld [vmem:[%s595_s1 + $0x58] sm:$0xff]  ;;  %v54_v29 = vld [vmem:[%s595_s1 + $0x50] sm:$0xff]  ;;  %v73_v32 = vld [vmem:[#allocation3 + $0x68] sm:$0xff] }
  0x9b   :  { %v198_v37 = vmul.f32 %v182_v30, %v63_v26  ;;  %v196_v38 = vmul.f32 %v180_v31, %v61_v28 }
  0x9c   :  { %v121_v39 = vpop.permute.xlu1 %120  ;;  %v116_v41 = vpop.permute.xlu0 %115 }
  0x9d   :  { %v184_v43 = vmul.f32 %v503_v18, %v121_v39  ;;  %v183_v44 = vmul.f32 %v503_v18, %v116_v41  ;;  %v212_v46 = vadd.f32 %v196_v38, %v45_v34  ;;  %v214_v48 = vadd.f32 %v198_v37, %v47_v36  ;;  %v72_v34 = vld [vmem:[#allocation3 + $0x60] sm:$0xff]  ;;  %v57_v39 = vld [vmem:[%s595_s1 + $0x68] sm:$0xff] }
  0x9f   :  { %v200_v50 = vmul.f32 %v184_v43, %v65_v40  ;;  %v199_v51 = vmul.f32 %v183_v44, %v64_v42  ;;  %v229_v52 = vpack.c.bf16 %v212_v46, %v211_v45  ;;  %v230_v60 = vpack.c.bf16 %v214_v48, %v213_v47  ;;  %v56_v43 = vld [vmem:[%s595_s1 + $0x60] sm:$0xff]  ;;  %v75_v45 = vld [vmem:[#allocation3 + $0x78] sm:$0xff]  ;;  %v74_v47 = vld [vmem:[#allocation3 + $0x70] sm:$0xff] }
  0xa0   :  { %v131_v54 = vpop.permute.xlu1 %130  ;;  %v126_v56 = vpop.permute.xlu0 %125 }
  0xa1   :  { %v186_v58 = vmul.f32 %v503_v18, %v131_v54  ;;  %v185_v59 = vmul.f32 %v503_v18, %v126_v56  ;;  %320 = vmatpush3.bf16.msra.mxu0 %v229_v52  ;;  %v216_v61 = vadd.f32 %v200_v50, %v49_v49  ;;  %v215_v62 = vadd.f32 %v199_v51, %v48_v53  ;;  %v58_v56 = vld [vmem:[%s595_s1 + $0x70] sm:$0xff] }
  0xa2   :  { %321 = vmatprep.subr.bf16.mxu0 %v400_v9 }
  0xa3   :  { %v202_v0 = vmul.f32 %v186_v58, %v67_v55  ;;  %v201_v2 = vmul.f32 %v185_v59, %v66_v57  ;;  %v231_v15 = vpack.c.bf16 %v216_v61, %v215_v62  ;;  %v59_v55 = vld [vmem:[%s595_s1 + $0x78] sm:$0xff]  ;;  %v227_v59 = vld [vmem:[%s594_s0] sm:$0xff]  ;;  %s402_s1 = smov [#allocation6]  }
  0xa4   :  { %v141_v3 = vpop.permute.xlu1 %140  ;;  %v136_v5 = vpop.permute.xlu0 %135  ;;  %v228_v61 = vpack.c.bf16 %v227_v59, %v227_v59  ;;  %v309_v62 = vld [vmem:[%s599_s5] ss:$0 sm:$0xff]  ;;  %s299_s26 = sshll.u32 %s402_s1, 4  ;;  %s300_s26 = int_to_ptr.vmem [resolvable:$true] %s299_s26 }
  0xa5   :  { %v188_v7 = vmul.f32 %v503_v18, %v141_v3  ;;  %v187_v8 = vmul.f32 %v503_v18, %v136_v5  ;;  %322 = vmatpush3.bf16.msra.mxu0 %v230_v60  ;;  %v218_v10 = vadd.f32 %v202_v0, %v51_v63  ;;  %v217_v11 = vadd.f32 %v201_v2, %v50_v1  ;;  %s370_s0 = scalar_lea.vmem %s300_s26, 128  ;;  %p375_p9 = scmp.lt.s32.totalorder %s300_s26, %s300_s26 }
  0xa6   :  { %323 = vmatprep.subr.bf16.mxu0 %v400_v9  ;;  %p371_p8 = scmp.ne.s32.totalorder %s300_s26, %s370_s0  ;;  %p376_p10 = scmp.lt.s32.totalorder %s370_s0, %s370_s0 }
  0xa7   :  { %v204_v13 = vmul.f32 %v188_v7, %v69_v4  ;;  %v203_v14 = vmul.f32 %v187_v8, %v68_v6  ;;  %v232_v24 = vpack.c.bf16 %v218_v10, %v217_v11 }
  0xa8   :  { %v151_v17 = vpop.permute.xlu1 %150  ;;  %v146_v20 = vpop.permute.xlu0 %145  ;;  %p377_p11 = por %p376_p10, %p375_p9 }
  0xa9   :  { %v190_v22 = vmul.f32 %v503_v18, %v151_v17  ;;  %v189_v23 = vmul.f32 %v503_v18, %v146_v20  ;;  %324 = vmatpush3.bf16.msra.mxu0 %v231_v15  ;;  %v220_v25 = vadd.f32 %v204_v13, %v53_v12  ;;  %v219_v26 = vadd.f32 %v203_v14, %v52_v16 }
  0xaa   :  { %325 = vmatprep.subr.bf16.mxu0 %v400_v9  ;;  %p378_p12 = pnand %p377_p11, %p371_p8 }
  0xab   :  { %v206_v28 = vmul.f32 %v190_v22, %v71_v19  ;;  %v205_v30 = vmul.f32 %v189_v23, %v70_v21  ;;  %v233_v42 = vpack.c.bf16 %v220_v25, %v219_v26 }
  0xac   :  { %v161_v31 = vpop.permute.xlu1 %160  ;;  %v156_v33 = vpop.permute.xlu0 %155 }
  0xad   :  { %v192_v35 = vmul.f32 %v503_v18, %v161_v31  ;;  %v191_v36 = vmul.f32 %v503_v18, %v156_v33  ;;  %326 = vmatpush3.bf16.msra.mxu0 %v232_v24  ;;  %v222_v37 = vadd.f32 %v206_v28, %v55_v27  ;;  %v221_v38 = vadd.f32 %v205_v30, %v54_v29 }
  0xae   :  { %327 = vmatprep.subr.bf16.mxu0 %v400_v9 }
  0xaf   :  { %v208_v40 = vmul.f32 %v192_v35, %v73_v32  ;;  %v207_v41 = vmul.f32 %v191_v36, %v72_v34  ;;  %v234_v50 = vpack.c.bf16 %v222_v37, %v221_v38 }
  0xb0   :  { %v171_v44 = vpop.permute.xlu1 %170  ;;  %v166_v46 = vpop.permute.xlu0 %165 }
  0xb1   :  { %v194_v48 = vmul.f32 %v503_v18, %v171_v44  ;;  %v193_v49 = vmul.f32 %v503_v18, %v166_v46  ;;  %328 = vmatpush3.bf16.msra.mxu0 %v233_v42  ;;  %v224_v51 = vadd.f32 %v208_v40, %v57_v39  ;;  %v223_v52 = vadd.f32 %v207_v41, %v56_v43 }
  0xb2   :  { %329 = vmatprep.subr.bf16.mxu0 %v400_v9 }
  0xb3   :  { %v210_v53 = vmul.f32 %v194_v48, %v75_v45  ;;  %v209_v54 = vmul.f32 %v193_v49, %v74_v47  ;;  %v235_v58 = vpack.c.bf16 %v224_v51, %v223_v52 }
  0xb5   :  { %330 = vmatpush3.bf16.msra.mxu0 %v234_v50  ;;  %v226_v18 = vadd.f32 %v210_v53, %v59_v55  ;;  %v225_v57 = vadd.f32 %v209_v54, %v58_v56 }
  0xb6   :  { %331 = vmatprep.subr.bf16.mxu0 %v400_v9 }
  0xb7   :  { %v236_v60 = vpack.c.bf16 %v226_v18, %v225_v57 }
  0xb9   :  { %332 = vmatpush3.bf16.msra.mxu0 %v235_v58 }
  0xba   :  { %333 = vmatprep.subr.bf16.mxu0 %v400_v9 }
  0xbd   :  { %334 = vmatpush3.bf16.msra.mxu0 %v236_v60 }
  0xc0   :  { %336 = vmatmul.mubr.bf16.vlgmr.msra.gmra.mrb[0].mxu0 %v228_v61 }
 0x193   :  { %v272_v63 = vpop.f32.mrb[0].mxu0 }
 0x194   :  { %v291_v0 = vadd.f32 %v309_v62, %v272_v63  ;;  %v337_v1 = vpop.f32.mrb[1].mxu0 }
 0x195   :  { %v275_v2 = vpop.f32.mrb[2].mxu0 }
 0x196   :  { %292 = vst [vmem:[#allocation6] sm:$0xff] %v291_v0  ;;  %v338_v3 = vpop.f32.mrb[3].mxu0 }
 0x197   :  { %381 = shalt.err (!%p378_p12)
}
 0x198   :  { %s382_s5 = scalar_lea.hbm %s600_s6, 128 }
 0x199   :  { %p383_p13 = scmp.ne.s32.totalorder %s600_s6, %s382_s5  ;;  %p386_p0 = scmp.lt.u32.totalorder %s382_s5, %s600_s6 }
 0x19b   :  { %p388_p1 = pnand %p386_p0, %p383_p13 }
 0x19d   :  { %391 = shalt.err (!%p388_p1)
}
 0x19e   :  { %302 = dma.vmem_to_hbm [thread:$0]  %s300_s26, 128, %s600_s6, [#allocation5]  }
 0x19f   :  { %394 = dma.done.wait [#allocation5], 128  }
 0x1a0   :  { %395 = vsyncadd [#allocation5], 4294967168 }
 0x1a1   :  { %306 = vsyncpa [#allocation4], 1 }
 0x1a2   :  { %307 = vsyncpa [#allocation5], 1 }

</bundles_post_ra>
